<compile_context>
chip_gen: v6e
topology: v6e:2x2x1
jax: 0.10.0
libtpu: 0.0.40
codegen_flags: <defaults>
</compile_context>

<pallas_src>
import jax
import jax.numpy as jnp
from jax.experimental import pallas as pl
from jax.experimental.pallas import tpu as pltpu


def lstm_music_kernel(x_ref, wih_t_ref, whh_t_ref, b_ref, wout_t_ref, bout_ref,
                      h0_ref, c0_ref,
                      pred_ref, hn_ref, cn_ref,
                      h_all_ref):
    """Single-invocation LSTM forward.

    x_ref     : (T*B, I)     all timesteps, flattened row-major as (t, b)
    wih_t_ref : (I, 4H)      transposed weight_ih_l0 (i/f/o rows pre-scaled 0.5)
    whh_t_ref : (H, 4H)      transposed weight_hh_l0 (i/f/o rows pre-scaled 0.5)
    b_ref     : (1, 4H)      bias_ih_l0 + bias_hh_l0 (i/f/o entries pre-scaled 0.5)
    wout_t_ref: (H, I_pad)   transposed out.weight, lane-padded to 128
    bout_ref  : (1, I_pad)   out.bias, lane-padded to 128
    h0/c0_ref : (B, H)       initial states (batch padded to 8)
    pred_ref  : (T, B, I_pad) sigmoid(Linear(h_t)) for every timestep
    hn/cn_ref : (B, H)       final states (written once)
    h_all_ref : (T*B, H)     VMEM scratch collecting h_t for the output matmul
    """
    B, H = h0_ref.shape
    TB = x_ref.shape[0]
    T = TB // B

    # --- Hoisted input projection (+ fused bias) for ALL timesteps: one MXU op,
    #     off the serial recurrence path.
    gates_x = (jnp.dot(x_ref[...], wih_t_ref[...],
                       preferred_element_type=jnp.float32)
               + b_ref[...])                                   # (T*B, 4H)

    w_hh_t = whh_t_ref[...]                                    # (H, 4H)
    # TODO(synk): pltpu.matmul_push_rhs/acc_lhs/pop could keep W_hh resident in
    # the MXU across the recurrence; kept as jnp.dot for robust lowering.

    h = h0_ref[...]                                            # (B, H)
    c = c0_ref[...]                                            # (B, H)

    # --- Recurrence: static unroll (T is a small trace-time constant).
    for t in range(T):
        gates = gates_x[t * B:(t + 1) * B] + jnp.dot(
            h, w_hh_t, preferred_element_type=jnp.float32)     # (B, 4H)

        # Single EUP push per step: i/f/o columns arrive pre-scaled by 0.5, so
        # sigmoid(x) = 0.5 * tanh(x/2) + 0.5 is one full-tile tanh + one fma.
        th = jnp.tanh(gates)
        sg = th * 0.5 + 0.5

        # PyTorch gate order [i, f, g, o].
        i_g = sg[:, 0 * H:1 * H]
        f_g = sg[:, 1 * H:2 * H]
        g_g = th[:, 2 * H:3 * H]
        o_g = sg[:, 3 * H:4 * H]

        c = f_g * c + i_g * g_g
        h = o_g * jnp.tanh(c)
        h_all_ref[t * B:(t + 1) * B, :] = h   # sublane-aligned scratch store

    # --- Batched output projection + sigmoid; W_out / bias are lane-padded to
    #     128 so the matmul result and the stores below are lane-dense.
    y = jnp.dot(h_all_ref[...], wout_t_ref[...],
                preferred_element_type=jnp.float32) + bout_ref[...]
    p = jax.nn.sigmoid(y)                                      # (T*B, I_pad)
    for t in range(T):
        pred_ref[t] = p[t * B:(t + 1) * B, :]                  # unmasked (B,128)

    # --- Final states, written once.
    hn_ref[...] = h
    cn_ref[...] = c


def prepare_params(w_ih, w_hh, b_ih, b_hh, w_out, b_out):
    """One-time parameter glue, kept OFF the jitted hot path.

    Pre-transposes the weights, fuses the two LSTM biases, pre-scales the
    i/f/o gate rows by 0.5 (sigmoid-via-tanh trick, numerically exact), and
    lane-pads the output projection to 128 columns for lane-dense stores.
    """
    H4, I = w_ih.shape
    H = H4 // 4
    idx = jnp.arange(H4)
    # PyTorch gate order [i, f, g, o]: scale i/f/o rows by 0.5, leave g rows.
    row_scale = jnp.where((idx >= 2 * H) & (idx < 3 * H), 1.0, 0.5).astype(jnp.float32)

    w_ih_t = (w_ih.astype(jnp.float32) * row_scale[:, None]).T           # (I, 4H)
    w_hh_t = (w_hh.astype(jnp.float32) * row_scale[:, None]).T           # (H, 4H)
    b = ((b_ih + b_hh).astype(jnp.float32) * row_scale).reshape(1, H4)   # (1, 4H)

    I_pad = max(128, ((I + 127) // 128) * 128)
    w_out_t = jnp.zeros((H, I_pad), jnp.float32).at[:, :I].set(
        w_out.astype(jnp.float32).T)                                     # (H, I_pad)
    b_o = jnp.zeros((1, I_pad), jnp.float32).at[0, :I].set(
        b_out.astype(jnp.float32))                                       # (1, I_pad)
    return w_ih_t, w_hh_t, b, w_out_t, b_o


@jax.jit
def lstm_music_forward(x, h_c_state, params):
    """Hot path: only batch-padding of x/h0/c0 + the pallas_call + output slices."""
    h0, c0 = h_c_state
    w_ih_t, w_hh_t, b, w_out_t, b_o = params
    T, B, I = x.shape
    H = w_hh_t.shape[0]
    I_pad = w_out_t.shape[1]

    # Pad batch to the f32 sublane count (8) so every (B, .) tile fills its
    # vreg sublanes / MXU rows; padding is sliced off below.
    B_pad = ((B + 7) // 8) * 8
    pad_b = B_pad - B

    xp = jnp.pad(x.astype(jnp.float32),
                 ((0, 0), (0, pad_b), (0, 0))).reshape(T * B_pad, I)
    h0p = jnp.pad(h0[0].astype(jnp.float32), ((0, pad_b), (0, 0)))
    c0p = jnp.pad(c0[0].astype(jnp.float32), ((0, pad_b), (0, 0)))

    vmem = pl.BlockSpec(memory_space=pltpu.MemorySpace.VMEM)
    out_shapes = (
        jax.ShapeDtypeStruct((T, B_pad, I_pad), jnp.float32),   # pred (lane-dense)
        jax.ShapeDtypeStruct((B_pad, H), jnp.float32),          # h_n
        jax.ShapeDtypeStruct((B_pad, H), jnp.float32),          # c_n
    )

    pred_p, h_n, c_n = pl.pallas_call(
        lstm_music_kernel,
        out_shape=out_shapes,
        in_specs=[vmem] * 8,
        out_specs=(vmem, vmem, vmem),
        scratch_shapes=[pltpu.VMEM((T * B_pad, H), jnp.float32)],
    )(xp, w_ih_t, w_hh_t, b, w_out_t, b_o, h0p, c0p)

    pred = pred_p[:, :B, :I]
    return pred, (h_n[:B][None], c_n[:B][None])


def _reference_forward(x, h0, c0, w_ih, w_hh, b_ih, b_hh, w_out, b_out):
    """Pure-JAX reference of the PyTorch forward (for a correctness check)."""
    H = h0.shape[-1]

    def step(carry, x_t):
        h, c = carry
        gates = x_t @ w_ih.T + h @ w_hh.T + b_ih + b_hh
        i = jax.nn.sigmoid(gates[:, 0 * H:1 * H])
        f = jax.nn.sigmoid(gates[:, 1 * H:2 * H])
        g = jnp.tanh(gates[:, 2 * H:3 * H])
        o = jax.nn.sigmoid(gates[:, 3 * H:4 * H])
        c_new = f * c + i * g
        h_new = o * jnp.tanh(c_new)
        return (h_new, c_new), h_new

    (h_n, c_n), hs = jax.lax.scan(step, (h0[0], c0[0]), x)
    pred = jax.nn.sigmoid(hs @ w_out.T + b_out)
    return pred, (h_n[None], c_n[None])


if __name__ == "__main__":
    # Small shapes consistent with the module: seq=8, batch=4, input=16, hidden=32.
    T, B, I, H = 8, 4, 16, 32

    key = jax.random.PRNGKey(0)
    ks = jax.random.split(key, 9)
    k = 1.0 / jnp.sqrt(H)  # PyTorch-style uniform init bound

    w_ih = jax.random.uniform(ks[0], (4 * H, I), jnp.float32, -k, k)   # weight_ih_l0
    w_hh = jax.random.uniform(ks[1], (4 * H, H), jnp.float32, -k, k)   # weight_hh_l0
    b_ih = jax.random.uniform(ks[2], (4 * H,), jnp.float32, -k, k)
    b_hh = jax.random.uniform(ks[3], (4 * H,), jnp.float32, -k, k)
    w_out = jax.random.uniform(ks[4], (I, H), jnp.float32, -k, k)      # out.weight
    b_out = jax.random.uniform(ks[5], (I,), jnp.float32, -k, k)        # out.bias

    x = jax.random.normal(ks[6], (T, B, I), jnp.float32)
    h0 = jax.random.normal(ks[7], (1, B, H), jnp.float32)
    c0 = jax.random.normal(ks[8], (1, B, H), jnp.float32)

    # One-time weight preparation (outside the jitted hot path).
    params = prepare_params(w_ih, w_hh, b_ih, b_hh, w_out, b_out)
    params = jax.tree_util.tree_map(jax.block_until_ready, params)

    pred, (h_n, c_n) = lstm_music_forward(x, (h0, c0), params)
    jax.block_until_ready((pred, h_n, c_n))

    # Sanity check against a pure-JAX reference of the PyTorch semantics.
    pred_ref, (hn_ref, cn_ref) = _reference_forward(
        x, h0, c0, w_ih, w_hh, b_ih, b_hh, w_out, b_out)
    assert jnp.allclose(pred, pred_ref, atol=1e-5, rtol=1e-5)
    assert jnp.allclose(h_n, hn_ref, atol=1e-5, rtol=1e-5)
    assert jnp.allclose(c_n, cn_ref, atol=1e-5, rtol=1e-5)

    print("KERNEL_OK")
</pallas_src>

<mosaic_0001>
module attributes {stable_mosaic.version = 11 : i64} {
  func.func @lstm_music_kernel(%arg0: memref<64x16xf32, #tpu.memory_space<vmem>>, %arg1: memref<16x128xf32, #tpu.memory_space<vmem>>, %arg2: memref<32x128xf32, #tpu.memory_space<vmem>>, %arg3: memref<1x128xf32, #tpu.memory_space<vmem>>, %arg4: memref<32x128xf32, #tpu.memory_space<vmem>>, %arg5: memref<1x128xf32, #tpu.memory_space<vmem>>, %arg6: memref<8x32xf32, #tpu.memory_space<vmem>>, %arg7: memref<8x32xf32, #tpu.memory_space<vmem>>, %arg8: memref<8x8x128xf32, #tpu.memory_space<vmem>>, %arg9: memref<8x32xf32, #tpu.memory_space<vmem>>, %arg10: memref<8x32xf32, #tpu.memory_space<vmem>>, %arg11: memref<64x32xf32, #tpu.memory_space<vmem>>) attributes {dimension_semantics = [], scalar_prefetch = 0 : i64, scratch_operands = 1 : i64, tpu.core_type = #tpu.core_type<tc>} {
    %c0 = arith.constant 0 : index
    %c0_0 = arith.constant 0 : index
    %0 = vector.load %arg0[%c0, %c0_0] : memref<64x16xf32, #tpu.memory_space<vmem>>, vector<64x16xf32>
    %c0_1 = arith.constant 0 : index
    %c0_2 = arith.constant 0 : index
    %1 = vector.load %arg1[%c0_1, %c0_2] : memref<16x128xf32, #tpu.memory_space<vmem>>, vector<16x128xf32>
    %cst = arith.constant dense<0.000000e+00> : vector<64x128xf32>
    %2 = tpu.matmul %0, %1, %cst {dimension_numbers = #tpu.dot_dimension_numbers<[1], [0], [0], [1], [0, 0, 1, 1], [], []>} : vector<64x16xf32>, vector<16x128xf32>, vector<64x128xf32> -> vector<64x128xf32>
    %c0_3 = arith.constant 0 : index
    %c0_4 = arith.constant 0 : index
    %3 = vector.load %arg3[%c0_3, %c0_4] : memref<1x128xf32, #tpu.memory_space<vmem>>, vector<1x128xf32>
    %4 = vector.broadcast %3 : vector<1x128xf32> to vector<64x128xf32>
    %5 = arith.addf %2, %4 : vector<64x128xf32>
    %c0_5 = arith.constant 0 : index
    %c0_6 = arith.constant 0 : index
    %6 = vector.load %arg2[%c0_5, %c0_6] : memref<32x128xf32, #tpu.memory_space<vmem>>, vector<32x128xf32>
    %c0_7 = arith.constant 0 : index
    %c0_8 = arith.constant 0 : index
    %7 = vector.load %arg6[%c0_7, %c0_8] : memref<8x32xf32, #tpu.memory_space<vmem>>, vector<8x32xf32>
    %c0_9 = arith.constant 0 : index
    %c0_10 = arith.constant 0 : index
    %8 = vector.load %arg7[%c0_9, %c0_10] : memref<8x32xf32, #tpu.memory_space<vmem>>, vector<8x32xf32>
    %9 = vector.extract_strided_slice %5 {offsets = [0, 0], sizes = [8, 128], strides = [1, 1]} : vector<64x128xf32> to vector<8x128xf32>
    %cst_11 = arith.constant dense<0.000000e+00> : vector<8x128xf32>
    %10 = tpu.matmul %7, %6, %cst_11 {dimension_numbers = #tpu.dot_dimension_numbers<[1], [0], [0], [1], [0, 0, 1, 1], [], []>} : vector<8x32xf32>, vector<32x128xf32>, vector<8x128xf32> -> vector<8x128xf32>
    %11 = arith.addf %9, %10 : vector<8x128xf32>
    %12 = math.tanh %11 : vector<8x128xf32>
    %cst_12 = arith.constant 5.000000e-01 : f32
    %13 = vector.broadcast %cst_12 : f32 to vector<8x128xf32>
    %14 = arith.mulf %12, %13 : vector<8x128xf32>
    %cst_13 = arith.constant 5.000000e-01 : f32
    %15 = vector.broadcast %cst_13 : f32 to vector<8x128xf32>
    %16 = arith.addf %14, %15 : vector<8x128xf32>
    %17 = vector.extract_strided_slice %16 {offsets = [0, 0], sizes = [8, 32], strides = [1, 1]} : vector<8x128xf32> to vector<8x32xf32>
    %18 = vector.extract_strided_slice %16 {offsets = [0, 32], sizes = [8, 32], strides = [1, 1]} : vector<8x128xf32> to vector<8x32xf32>
    %19 = vector.extract_strided_slice %12 {offsets = [0, 64], sizes = [8, 32], strides = [1, 1]} : vector<8x128xf32> to vector<8x32xf32>
    %20 = vector.extract_strided_slice %16 {offsets = [0, 96], sizes = [8, 32], strides = [1, 1]} : vector<8x128xf32> to vector<8x32xf32>
    %21 = arith.mulf %18, %8 : vector<8x32xf32>
    %22 = arith.mulf %17, %19 : vector<8x32xf32>
    %23 = arith.addf %21, %22 : vector<8x32xf32>
    %24 = math.tanh %23 : vector<8x32xf32>
    %25 = arith.mulf %20, %24 : vector<8x32xf32>
    %c0_14 = arith.constant 0 : index
    %c0_15 = arith.constant 0 : index
    %26 = vector.load %arg11[%c0_14, %c0_15] : memref<64x32xf32, #tpu.memory_space<vmem>>, vector<8x32xf32>
    tpu.vector_store %arg11[%c0_14, %c0_15], %25 {strides = array<i32>} : memref<64x32xf32, #tpu.memory_space<vmem>>, vector<8x32xf32>,
    %27 = vector.extract_strided_slice %5 {offsets = [8, 0], sizes = [8, 128], strides = [1, 1]} : vector<64x128xf32> to vector<8x128xf32>
    %cst_16 = arith.constant dense<0.000000e+00> : vector<8x128xf32>
    %28 = tpu.matmul %25, %6, %cst_16 {dimension_numbers = #tpu.dot_dimension_numbers<[1], [0], [0], [1], [0, 0, 1, 1], [], []>} : vector<8x32xf32>, vector<32x128xf32>, vector<8x128xf32> -> vector<8x128xf32>
    %29 = arith.addf %27, %28 : vector<8x128xf32>
    %30 = math.tanh %29 : vector<8x128xf32>
    %cst_17 = arith.constant 5.000000e-01 : f32
    %31 = vector.broadcast %cst_17 : f32 to vector<8x128xf32>
    %32 = arith.mulf %30, %31 : vector<8x128xf32>
    %cst_18 = arith.constant 5.000000e-01 : f32
    %33 = vector.broadcast %cst_18 : f32 to vector<8x128xf32>
    %34 = arith.addf %32, %33 : vector<8x128xf32>
    %35 = vector.extract_strided_slice %34 {offsets = [0, 0], sizes = [8, 32], strides = [1, 1]} : vector<8x128xf32> to vector<8x32xf32>
    %36 = vector.extract_strided_slice %34 {offsets = [0, 32], sizes = [8, 32], strides = [1, 1]} : vector<8x128xf32> to vector<8x32xf32>
    %37 = vector.extract_strided_slice %30 {offsets = [0, 64], sizes = [8, 32], strides = [1, 1]} : vector<8x128xf32> to vector<8x32xf32>
    %38 = vector.extract_strided_slice %34 {offsets = [0, 96], sizes = [8, 32], strides = [1, 1]} : vector<8x128xf32> to vector<8x32xf32>
    %39 = arith.mulf %36, %23 : vector<8x32xf32>
    %40 = arith.mulf %35, %37 : vector<8x32xf32>
    %41 = arith.addf %39, %40 : vector<8x32xf32>
    %42 = math.tanh %41 : vector<8x32xf32>
    %43 = arith.mulf %38, %42 : vector<8x32xf32>
    %c8 = arith.constant 8 : index
    %c0_19 = arith.constant 0 : index
    %44 = vector.load %arg11[%c8, %c0_19] : memref<64x32xf32, #tpu.memory_space<vmem>>, vector<8x32xf32>
    tpu.vector_store %arg11[%c8, %c0_19], %43 {strides = array<i32>} : memref<64x32xf32, #tpu.memory_space<vmem>>, vector<8x32xf32>,
    %45 = vector.extract_strided_slice %5 {offsets = [16, 0], sizes = [8, 128], strides = [1, 1]} : vector<64x128xf32> to vector<8x128xf32>
    %cst_20 = arith.constant dense<0.000000e+00> : vector<8x128xf32>
    %46 = tpu.matmul %43, %6, %cst_20 {dimension_numbers = #tpu.dot_dimension_numbers<[1], [0], [0], [1], [0, 0, 1, 1], [], []>} : vector<8x32xf32>, vector<32x128xf32>, vector<8x128xf32> -> vector<8x128xf32>
    %47 = arith.addf %45, %46 : vector<8x128xf32>
    %48 = math.tanh %47 : vector<8x128xf32>
    %cst_21 = arith.constant 5.000000e-01 : f32
    %49 = vector.broadcast %cst_21 : f32 to vector<8x128xf32>
    %50 = arith.mulf %48, %49 : vector<8x128xf32>
    %cst_22 = arith.constant 5.000000e-01 : f32
    %51 = vector.broadcast %cst_22 : f32 to vector<8x128xf32>
    %52 = arith.addf %50, %51 : vector<8x128xf32>
    %53 = vector.extract_strided_slice %52 {offsets = [0, 0], sizes = [8, 32], strides = [1, 1]} : vector<8x128xf32> to vector<8x32xf32>
    %54 = vector.extract_strided_slice %52 {offsets = [0, 32], sizes = [8, 32], strides = [1, 1]} : vector<8x128xf32> to vector<8x32xf32>
    %55 = vector.extract_strided_slice %48 {offsets = [0, 64], sizes = [8, 32], strides = [1, 1]} : vector<8x128xf32> to vector<8x32xf32>
    %56 = vector.extract_strided_slice %52 {offsets = [0, 96], sizes = [8, 32], strides = [1, 1]} : vector<8x128xf32> to vector<8x32xf32>
    %57 = arith.mulf %54, %41 : vector<8x32xf32>
    %58 = arith.mulf %53, %55 : vector<8x32xf32>
    %59 = arith.addf %57, %58 : vector<8x32xf32>
    %60 = math.tanh %59 : vector<8x32xf32>
    %61 = arith.mulf %56, %60 : vector<8x32xf32>
    %c16 = arith.constant 16 : index
    %c0_23 = arith.constant 0 : index
    %62 = vector.load %arg11[%c16, %c0_23] : memref<64x32xf32, #tpu.memory_space<vmem>>, vector<8x32xf32>
    tpu.vector_store %arg11[%c16, %c0_23], %61 {strides = array<i32>} : memref<64x32xf32, #tpu.memory_space<vmem>>, vector<8x32xf32>,
    %63 = vector.extract_strided_slice %5 {offsets = [24, 0], sizes = [8, 128], strides = [1, 1]} : vector<64x128xf32> to vector<8x128xf32>
    %cst_24 = arith.constant dense<0.000000e+00> : vector<8x128xf32>
    %64 = tpu.matmul %61, %6, %cst_24 {dimension_numbers = #tpu.dot_dimension_numbers<[1], [0], [0], [1], [0, 0, 1, 1], [], []>} : vector<8x32xf32>, vector<32x128xf32>, vector<8x128xf32> -> vector<8x128xf32>
    %65 = arith.addf %63, %64 : vector<8x128xf32>
    %66 = math.tanh %65 : vector<8x128xf32>
    %cst_25 = arith.constant 5.000000e-01 : f32
    %67 = vector.broadcast %cst_25 : f32 to vector<8x128xf32>
    %68 = arith.mulf %66, %67 : vector<8x128xf32>
    %cst_26 = arith.constant 5.000000e-01 : f32
    %69 = vector.broadcast %cst_26 : f32 to vector<8x128xf32>
    %70 = arith.addf %68, %69 : vector<8x128xf32>
    %71 = vector.extract_strided_slice %70 {offsets = [0, 0], sizes = [8, 32], strides = [1, 1]} : vector<8x128xf32> to vector<8x32xf32>
    %72 = vector.extract_strided_slice %70 {offsets = [0, 32], sizes = [8, 32], strides = [1, 1]} : vector<8x128xf32> to vector<8x32xf32>
    %73 = vector.extract_strided_slice %66 {offsets = [0, 64], sizes = [8, 32], strides = [1, 1]} : vector<8x128xf32> to vector<8x32xf32>
    %74 = vector.extract_strided_slice %70 {offsets = [0, 96], sizes = [8, 32], strides = [1, 1]} : vector<8x128xf32> to vector<8x32xf32>
    %75 = arith.mulf %72, %59 : vector<8x32xf32>
    %76 = arith.mulf %71, %73 : vector<8x32xf32>
    %77 = arith.addf %75, %76 : vector<8x32xf32>
    %78 = math.tanh %77 : vector<8x32xf32>
    %79 = arith.mulf %74, %78 : vector<8x32xf32>
    %c24 = arith.constant 24 : index
    %c0_27 = arith.constant 0 : index
    %80 = vector.load %arg11[%c24, %c0_27] : memref<64x32xf32, #tpu.memory_space<vmem>>, vector<8x32xf32>
    tpu.vector_store %arg11[%c24, %c0_27], %79 {strides = array<i32>} : memref<64x32xf32, #tpu.memory_space<vmem>>, vector<8x32xf32>,
    %81 = vector.extract_strided_slice %5 {offsets = [32, 0], sizes = [8, 128], strides = [1, 1]} : vector<64x128xf32> to vector<8x128xf32>
    %cst_28 = arith.constant dense<0.000000e+00> : vector<8x128xf32>
    %82 = tpu.matmul %79, %6, %cst_28 {dimension_numbers = #tpu.dot_dimension_numbers<[1], [0], [0], [1], [0, 0, 1, 1], [], []>} : vector<8x32xf32>, vector<32x128xf32>, vector<8x128xf32> -> vector<8x128xf32>
    %83 = arith.addf %81, %82 : vector<8x128xf32>
    %84 = math.tanh %83 : vector<8x128xf32>
    %cst_29 = arith.constant 5.000000e-01 : f32
    %85 = vector.broadcast %cst_29 : f32 to vector<8x128xf32>
    %86 = arith.mulf %84, %85 : vector<8x128xf32>
    %cst_30 = arith.constant 5.000000e-01 : f32
    %87 = vector.broadcast %cst_30 : f32 to vector<8x128xf32>
    %88 = arith.addf %86, %87 : vector<8x128xf32>
    %89 = vector.extract_strided_slice %88 {offsets = [0, 0], sizes = [8, 32], strides = [1, 1]} : vector<8x128xf32> to vector<8x32xf32>
    %90 = vector.extract_strided_slice %88 {offsets = [0, 32], sizes = [8, 32], strides = [1, 1]} : vector<8x128xf32> to vector<8x32xf32>
    %91 = vector.extract_strided_slice %84 {offsets = [0, 64], sizes = [8, 32], strides = [1, 1]} : vector<8x128xf32> to vector<8x32xf32>
    %92 = vector.extract_strided_slice %88 {offsets = [0, 96], sizes = [8, 32], strides = [1, 1]} : vector<8x128xf32> to vector<8x32xf32>
    %93 = arith.mulf %90, %77 : vector<8x32xf32>
    %94 = arith.mulf %89, %91 : vector<8x32xf32>
    %95 = arith.addf %93, %94 : vector<8x32xf32>
    %96 = math.tanh %95 : vector<8x32xf32>
    %97 = arith.mulf %92, %96 : vector<8x32xf32>
    %c32 = arith.constant 32 : index
    %c0_31 = arith.constant 0 : index
    %98 = vector.load %arg11[%c32, %c0_31] : memref<64x32xf32, #tpu.memory_space<vmem>>, vector<8x32xf32>
    tpu.vector_store %arg11[%c32, %c0_31], %97 {strides = array<i32>} : memref<64x32xf32, #tpu.memory_space<vmem>>, vector<8x32xf32>,
    %99 = vector.extract_strided_slice %5 {offsets = [40, 0], sizes = [8, 128], strides = [1, 1]} : vector<64x128xf32> to vector<8x128xf32>
    %cst_32 = arith.constant dense<0.000000e+00> : vector<8x128xf32>
    %100 = tpu.matmul %97, %6, %cst_32 {dimension_numbers = #tpu.dot_dimension_numbers<[1], [0], [0], [1], [0, 0, 1, 1], [], []>} : vector<8x32xf32>, vector<32x128xf32>, vector<8x128xf32> -> vector<8x128xf32>
    %101 = arith.addf %99, %100 : vector<8x128xf32>
    %102 = math.tanh %101 : vector<8x128xf32>
    %cst_33 = arith.constant 5.000000e-01 : f32
    %103 = vector.broadcast %cst_33 : f32 to vector<8x128xf32>
    %104 = arith.mulf %102, %103 : vector<8x128xf32>
    %cst_34 = arith.constant 5.000000e-01 : f32
    %105 = vector.broadcast %cst_34 : f32 to vector<8x128xf32>
    %106 = arith.addf %104, %105 : vector<8x128xf32>
    %107 = vector.extract_strided_slice %106 {offsets = [0, 0], sizes = [8, 32], strides = [1, 1]} : vector<8x128xf32> to vector<8x32xf32>
    %108 = vector.extract_strided_slice %106 {offsets = [0, 32], sizes = [8, 32], strides = [1, 1]} : vector<8x128xf32> to vector<8x32xf32>
    %109 = vector.extract_strided_slice %102 {offsets = [0, 64], sizes = [8, 32], strides = [1, 1]} : vector<8x128xf32> to vector<8x32xf32>
    %110 = vector.extract_strided_slice %106 {offsets = [0, 96], sizes = [8, 32], strides = [1, 1]} : vector<8x128xf32> to vector<8x32xf32>
    %111 = arith.mulf %108, %95 : vector<8x32xf32>
    %112 = arith.mulf %107, %109 : vector<8x32xf32>
    %113 = arith.addf %111, %112 : vector<8x32xf32>
    %114 = math.tanh %113 : vector<8x32xf32>
    %115 = arith.mulf %110, %114 : vector<8x32xf32>
    %c40 = arith.constant 40 : index
    %c0_35 = arith.constant 0 : index
    %116 = vector.load %arg11[%c40, %c0_35] : memref<64x32xf32, #tpu.memory_space<vmem>>, vector<8x32xf32>
    tpu.vector_store %arg11[%c40, %c0_35], %115 {strides = array<i32>} : memref<64x32xf32, #tpu.memory_space<vmem>>, vector<8x32xf32>,
    %117 = vector.extract_strided_slice %5 {offsets = [48, 0], sizes = [8, 128], strides = [1, 1]} : vector<64x128xf32> to vector<8x128xf32>
    %cst_36 = arith.constant dense<0.000000e+00> : vector<8x128xf32>
    %118 = tpu.matmul %115, %6, %cst_36 {dimension_numbers = #tpu.dot_dimension_numbers<[1], [0], [0], [1], [0, 0, 1, 1], [], []>} : vector<8x32xf32>, vector<32x128xf32>, vector<8x128xf32> -> vector<8x128xf32>
    %119 = arith.addf %117, %118 : vector<8x128xf32>
    %120 = math.tanh %119 : vector<8x128xf32>
    %cst_37 = arith.constant 5.000000e-01 : f32
    %121 = vector.broadcast %cst_37 : f32 to vector<8x128xf32>
    %122 = arith.mulf %120, %121 : vector<8x128xf32>
    %cst_38 = arith.constant 5.000000e-01 : f32
    %123 = vector.broadcast %cst_38 : f32 to vector<8x128xf32>
    %124 = arith.addf %122, %123 : vector<8x128xf32>
    %125 = vector.extract_strided_slice %124 {offsets = [0, 0], sizes = [8, 32], strides = [1, 1]} : vector<8x128xf32> to vector<8x32xf32>
    %126 = vector.extract_strided_slice %124 {offsets = [0, 32], sizes = [8, 32], strides = [1, 1]} : vector<8x128xf32> to vector<8x32xf32>
    %127 = vector.extract_strided_slice %120 {offsets = [0, 64], sizes = [8, 32], strides = [1, 1]} : vector<8x128xf32> to vector<8x32xf32>
    %128 = vector.extract_strided_slice %124 {offsets = [0, 96], sizes = [8, 32], strides = [1, 1]} : vector<8x128xf32> to vector<8x32xf32>
    %129 = arith.mulf %126, %113 : vector<8x32xf32>
    %130 = arith.mulf %125, %127 : vector<8x32xf32>
    %131 = arith.addf %129, %130 : vector<8x32xf32>
    %132 = math.tanh %131 : vector<8x32xf32>
    %133 = arith.mulf %128, %132 : vector<8x32xf32>
    %c48 = arith.constant 48 : index
    %c0_39 = arith.constant 0 : index
    %134 = vector.load %arg11[%c48, %c0_39] : memref<64x32xf32, #tpu.memory_space<vmem>>, vector<8x32xf32>
    tpu.vector_store %arg11[%c48, %c0_39], %133 {strides = array<i32>} : memref<64x32xf32, #tpu.memory_space<vmem>>, vector<8x32xf32>,
    %135 = vector.extract_strided_slice %5 {offsets = [56, 0], sizes = [8, 128], strides = [1, 1]} : vector<64x128xf32> to vector<8x128xf32>
    %cst_40 = arith.constant dense<0.000000e+00> : vector<8x128xf32>
    %136 = tpu.matmul %133, %6, %cst_40 {dimension_numbers = #tpu.dot_dimension_numbers<[1], [0], [0], [1], [0, 0, 1, 1], [], []>} : vector<8x32xf32>, vector<32x128xf32>, vector<8x128xf32> -> vector<8x128xf32>
    %137 = arith.addf %135, %136 : vector<8x128xf32>
    %138 = math.tanh %137 : vector<8x128xf32>
    %cst_41 = arith.constant 5.000000e-01 : f32
    %139 = vector.broadcast %cst_41 : f32 to vector<8x128xf32>
    %140 = arith.mulf %138, %139 : vector<8x128xf32>
    %cst_42 = arith.constant 5.000000e-01 : f32
    %141 = vector.broadcast %cst_42 : f32 to vector<8x128xf32>
    %142 = arith.addf %140, %141 : vector<8x128xf32>
    %143 = vector.extract_strided_slice %142 {offsets = [0, 0], sizes = [8, 32], strides = [1, 1]} : vector<8x128xf32> to vector<8x32xf32>
    %144 = vector.extract_strided_slice %142 {offsets = [0, 32], sizes = [8, 32], strides = [1, 1]} : vector<8x128xf32> to vector<8x32xf32>
    %145 = vector.extract_strided_slice %138 {offsets = [0, 64], sizes = [8, 32], strides = [1, 1]} : vector<8x128xf32> to vector<8x32xf32>
    %146 = vector.extract_strided_slice %142 {offsets = [0, 96], sizes = [8, 32], strides = [1, 1]} : vector<8x128xf32> to vector<8x32xf32>
    %147 = arith.mulf %144, %131 : vector<8x32xf32>
    %148 = arith.mulf %143, %145 : vector<8x32xf32>
    %149 = arith.addf %147, %148 : vector<8x32xf32>
    %150 = math.tanh %149 : vector<8x32xf32>
    %151 = arith.mulf %146, %150 : vector<8x32xf32>
    %c56 = arith.constant 56 : index
    %c0_43 = arith.constant 0 : index
    %152 = vector.load %arg11[%c56, %c0_43] : memref<64x32xf32, #tpu.memory_space<vmem>>, vector<8x32xf32>
    tpu.vector_store %arg11[%c56, %c0_43], %151 {strides = array<i32>} : memref<64x32xf32, #tpu.memory_space<vmem>>, vector<8x32xf32>,
    %c0_44 = arith.constant 0 : index
    %c0_45 = arith.constant 0 : index
    %153 = vector.load %arg11[%c0_44, %c0_45] : memref<64x32xf32, #tpu.memory_space<vmem>>, vector<64x32xf32>
    %c0_46 = arith.constant 0 : index
    %c0_47 = arith.constant 0 : index
    %154 = vector.load %arg4[%c0_46, %c0_47] : memref<32x128xf32, #tpu.memory_space<vmem>>, vector<32x128xf32>
    %cst_48 = arith.constant dense<0.000000e+00> : vector<64x128xf32>
    %155 = tpu.matmul %153, %154, %cst_48 {dimension_numbers = #tpu.dot_dimension_numbers<[1], [0], [0], [1], [0, 0, 1, 1], [], []>} : vector<64x32xf32>, vector<32x128xf32>, vector<64x128xf32> -> vector<64x128xf32>
    %c0_49 = arith.constant 0 : index
    %c0_50 = arith.constant 0 : index
    %156 = vector.load %arg5[%c0_49, %c0_50] : memref<1x128xf32, #tpu.memory_space<vmem>>, vector<1x128xf32>
    %157 = vector.broadcast %156 : vector<1x128xf32> to vector<64x128xf32>
    %158 = arith.addf %155, %157 : vector<64x128xf32>
    %159 = arith.negf %158 : vector<64x128xf32>
    %160 = math.exp %159 : vector<64x128xf32>
    %cst_51 = arith.constant 1.000000e+00 : f32
    %161 = vector.broadcast %cst_51 : f32 to vector<64x128xf32>
    %162 = arith.addf %161, %160 : vector<64x128xf32>
    %163 = arith.divf %161, %162 : vector<64x128xf32>
    %164 = vector.extract_strided_slice %163 {offsets = [0, 0], sizes = [8, 128], strides = [1, 1]} : vector<64x128xf32> to vector<8x128xf32>
    %c0_52 = arith.constant 0 : index
    %c0_53 = arith.constant 0 : index
    %c0_54 = arith.constant 0 : index
    %165 = vector.load %arg8[%c0_52, %c0_53, %c0_54] : memref<8x8x128xf32, #tpu.memory_space<vmem>>, vector<1x8x128xf32>
    %166 = vector.shape_cast %165 : vector<1x8x128xf32> to vector<8x128xf32>
    %167 = vector.shape_cast %164 : vector<8x128xf32> to vector<1x8x128xf32>
    tpu.vector_store %arg8[%c0_52, %c0_53, %c0_54], %167 {strides = array<i32>} : memref<8x8x128xf32, #tpu.memory_space<vmem>>, vector<1x8x128xf32>,
    %168 = vector.extract_strided_slice %163 {offsets = [8, 0], sizes = [8, 128], strides = [1, 1]} : vector<64x128xf32> to vector<8x128xf32>
    %c1 = arith.constant 1 : index
    %c0_55 = arith.constant 0 : index
    %c0_56 = arith.constant 0 : index
    %169 = vector.load %arg8[%c1, %c0_55, %c0_56] : memref<8x8x128xf32, #tpu.memory_space<vmem>>, vector<1x8x128xf32>
    %170 = vector.shape_cast %169 : vector<1x8x128xf32> to vector<8x128xf32>
    %171 = vector.shape_cast %168 : vector<8x128xf32> to vector<1x8x128xf32>
    tpu.vector_store %arg8[%c1, %c0_55, %c0_56], %171 {strides = array<i32>} : memref<8x8x128xf32, #tpu.memory_space<vmem>>, vector<1x8x128xf32>,
    %172 = vector.extract_strided_slice %163 {offsets = [16, 0], sizes = [8, 128], strides = [1, 1]} : vector<64x128xf32> to vector<8x128xf32>
    %c2 = arith.constant 2 : index
    %c0_57 = arith.constant 0 : index
    %c0_58 = arith.constant 0 : index
    %173 = vector.load %arg8[%c2, %c0_57, %c0_58] : memref<8x8x128xf32, #tpu.memory_space<vmem>>, vector<1x8x128xf32>
    %174 = vector.shape_cast %173 : vector<1x8x128xf32> to vector<8x128xf32>
    %175 = vector.shape_cast %172 : vector<8x128xf32> to vector<1x8x128xf32>
    tpu.vector_store %arg8[%c2, %c0_57, %c0_58], %175 {strides = array<i32>} : memref<8x8x128xf32, #tpu.memory_space<vmem>>, vector<1x8x128xf32>,
    %176 = vector.extract_strided_slice %163 {offsets = [24, 0], sizes = [8, 128], strides = [1, 1]} : vector<64x128xf32> to vector<8x128xf32>
    %c3 = arith.constant 3 : index
    %c0_59 = arith.constant 0 : index
    %c0_60 = arith.constant 0 : index
    %177 = vector.load %arg8[%c3, %c0_59, %c0_60] : memref<8x8x128xf32, #tpu.memory_space<vmem>>, vector<1x8x128xf32>
    %178 = vector.shape_cast %177 : vector<1x8x128xf32> to vector<8x128xf32>
    %179 = vector.shape_cast %176 : vector<8x128xf32> to vector<1x8x128xf32>
    tpu.vector_store %arg8[%c3, %c0_59, %c0_60], %179 {strides = array<i32>} : memref<8x8x128xf32, #tpu.memory_space<vmem>>, vector<1x8x128xf32>,
    %180 = vector.extract_strided_slice %163 {offsets = [32, 0], sizes = [8, 128], strides = [1, 1]} : vector<64x128xf32> to vector<8x128xf32>
    %c4 = arith.constant 4 : index
    %c0_61 = arith.constant 0 : index
    %c0_62 = arith.constant 0 : index
    %181 = vector.load %arg8[%c4, %c0_61, %c0_62] : memref<8x8x128xf32, #tpu.memory_space<vmem>>, vector<1x8x128xf32>
    %182 = vector.shape_cast %181 : vector<1x8x128xf32> to vector<8x128xf32>
    %183 = vector.shape_cast %180 : vector<8x128xf32> to vector<1x8x128xf32>
    tpu.vector_store %arg8[%c4, %c0_61, %c0_62], %183 {strides = array<i32>} : memref<8x8x128xf32, #tpu.memory_space<vmem>>, vector<1x8x128xf32>,
    %184 = vector.extract_strided_slice %163 {offsets = [40, 0], sizes = [8, 128], strides = [1, 1]} : vector<64x128xf32> to vector<8x128xf32>
    %c5 = arith.constant 5 : index
    %c0_63 = arith.constant 0 : index
    %c0_64 = arith.constant 0 : index
    %185 = vector.load %arg8[%c5, %c0_63, %c0_64] : memref<8x8x128xf32, #tpu.memory_space<vmem>>, vector<1x8x128xf32>
    %186 = vector.shape_cast %185 : vector<1x8x128xf32> to vector<8x128xf32>
    %187 = vector.shape_cast %184 : vector<8x128xf32> to vector<1x8x128xf32>
    tpu.vector_store %arg8[%c5, %c0_63, %c0_64], %187 {strides = array<i32>} : memref<8x8x128xf32, #tpu.memory_space<vmem>>, vector<1x8x128xf32>,
    %188 = vector.extract_strided_slice %163 {offsets = [48, 0], sizes = [8, 128], strides = [1, 1]} : vector<64x128xf32> to vector<8x128xf32>
    %c6 = arith.constant 6 : index
    %c0_65 = arith.constant 0 : index
    %c0_66 = arith.constant 0 : index
    %189 = vector.load %arg8[%c6, %c0_65, %c0_66] : memref<8x8x128xf32, #tpu.memory_space<vmem>>, vector<1x8x128xf32>
    %190 = vector.shape_cast %189 : vector<1x8x128xf32> to vector<8x128xf32>
    %191 = vector.shape_cast %188 : vector<8x128xf32> to vector<1x8x128xf32>
    tpu.vector_store %arg8[%c6, %c0_65, %c0_66], %191 {strides = array<i32>} : memref<8x8x128xf32, #tpu.memory_space<vmem>>, vector<1x8x128xf32>,
    %192 = vector.extract_strided_slice %163 {offsets = [56, 0], sizes = [8, 128], strides = [1, 1]} : vector<64x128xf32> to vector<8x128xf32>
    %c7 = arith.constant 7 : index
    %c0_67 = arith.constant 0 : index
    %c0_68 = arith.constant 0 : index
    %193 = vector.load %arg8[%c7, %c0_67, %c0_68] : memref<8x8x128xf32, #tpu.memory_space<vmem>>, vector<1x8x128xf32>
    %194 = vector.shape_cast %193 : vector<1x8x128xf32> to vector<8x128xf32>
    %195 = vector.shape_cast %192 : vector<8x128xf32> to vector<1x8x128xf32>
    tpu.vector_store %arg8[%c7, %c0_67, %c0_68], %195 {strides = array<i32>} : memref<8x8x128xf32, #tpu.memory_space<vmem>>, vector<1x8x128xf32>,
    %c0_69 = arith.constant 0 : index
    %c0_70 = arith.constant 0 : index
    %196 = vector.load %arg9[%c0_69, %c0_70] : memref<8x32xf32, #tpu.memory_space<vmem>>, vector<8x32xf32>
    tpu.vector_store %arg9[%c0_69, %c0_70], %151 {strides = array<i32>} : memref<8x32xf32, #tpu.memory_space<vmem>>, vector<8x32xf32>,
    %c0_71 = arith.constant 0 : index
    %c0_72 = arith.constant 0 : index
    %197 = vector.load %arg10[%c0_71, %c0_72] : memref<8x32xf32, #tpu.memory_space<vmem>>, vector<8x32xf32>
    tpu.vector_store %arg10[%c0_71, %c0_72], %149 {strides = array<i32>} : memref<8x32xf32, #tpu.memory_space<vmem>>, vector<8x32xf32>,
    return
  }
}

</mosaic_0001>

<bundles_post_ra>
// kernel: lstm_music_forward.1
= control target key start
LH: loop header
LB: loop body
LE: loop exit
PB: predicated region body
PF: predicated region fallthrough
CT: control target
= control target key end

     0   :  { %vm49_vm0 = vcmask 130048   ;;  %v1504_v6 = vmov 0.0   ;;  %vm1505_vm1 = vmmov 0   ;;  %vm185_vm2 = vcmask 261120   ;;  %s1506_s18 = smov 64   ;;  %s1507_s21 = smov 32   ;;  %s1851_s1 = inlined_call_operand.vmem [shape: f32[16,128], index: 1, kind: input, shape index: {}]   ;;  %s1852_s0 = inlined_call_operand.vmem [shape: f32[64,16], index: 0, kind: input, shape index: {}]   ;;  %s1853_s2 = inlined_call_operand.vmem [shape: f32[32,128], index: 2, kind: input, shape index: {}]   ;;  %s1854_s6 = inlined_call_operand.vmem [shape: f32[8,32], index: 6, kind: input, shape index: {}]   ;;  %s1855_s3 = inlined_call_operand.vmem [shape: f32[1,128], index: 3, kind: input, shape index: {}]   ;;  %s1856_s7 = inlined_call_operand.vmem [shape: f32[8,32], index: 7, kind: input, shape index: {}]   ;;  %s1857_s4 = inlined_call_operand.vmem [shape: f32[32,128], index: 4, kind: input, shape index: {}]   ;;  %s1858_s5 = inlined_call_operand.vmem [shape: f32[1,128], index: 5, kind: input, shape index: {}]   ;;  %s1859_s8 = inlined_call_operand.vmem [shape: f32[8,8,128], index: 8, kind: output, shape index: {0}]   ;;  %s1860_s10 = inlined_call_operand.vmem [shape: f32[8,32], index: 10, kind: output, shape index: {2}]   ;;  %s1861_s9 = inlined_call_operand.vmem [shape: f32[8,32], index: 9, kind: output, shape index: {1}]  }
   0x1   :  { %v41_v0 = vld [vmem:[%s1851_s1 + $0x8] sm:$0xff]  ;;  %v40_v1 = vld [vmem:[%s1851_s1] sm:$0xff]  ;;  %v1580_v4 = vld [vmem:[%s1853_s2 + $0x18] sm:$0xff] }
   0x2   :  { %v36_v2 = vld [vmem:[%s1852_s0 + $0x20] sm:$0xff]  ;;  %1431 = vmatprep.subr.mxu1 %v41_v0  ;;  %1307 = vmatprep.subr.mxu0 %v41_v0  ;;  %v37_v3 = vld [vmem:[%s1852_s0 + $0x28] sm:$0xff]  ;;  %v38_v8 = vld [vmem:[%s1852_s0 + $0x30] sm:$0xff] }
   0x3   :  { %1433 = vmatpush3.msra.mxu1 %v41_v0  ;;  %1317 = vmatprep.mubr.msk.f32.mxu1 %vm49_vm0, %v36_v2  ;;  %v32_v5 = vld [vmem:[%s1852_s0] sm:$0xff]  ;;  %v33_v7 = vld [vmem:[%s1852_s0 + $0x8] sm:$0xff]  ;;  %v1597_v9 = vld [vmem:[%s1853_s2 + $0x10] sm:$0xff] }
   0x4   :  { %1432 = vmatprep.subr.mxu1 %v40_v1  ;;  %1308 = vmatpush3.msra.mxu0 %v41_v0  ;;  %v39_v10 = vld [vmem:[%s1852_s0 + $0x38] sm:$0xff]  ;;  %v1609_v11 = vld [vmem:[%s1853_s2 + $0x8] sm:$0xff]  ;;  %v1618_v12 = vld [vmem:[%s1853_s2] sm:$0xff] }
   0x5   :  { %1434 = vmatpush3.msra.mxu1 %v40_v1  ;;  %1309 = vmatprep.subr.mxu0 %v40_v1  ;;  %v183_v13 = vld [vmem:[%s1854_s6] sm:$0xff]  ;;  %v34_v51 = vld [vmem:[%s1852_s0 + $0x10] sm:$0xff]  ;;  %v35_v52 = vld [vmem:[%s1852_s0 + $0x18] sm:$0xff] }
   0x6   :  { %1318 = vmatmul.mubr.msk.f32.vlgmr.msra.gmra.mxu1 %vm49_vm0, %v37_v3  ;;  %1323 = vmatprep.subr.mxu1 %v1504_v6  ;;  %v1657_v19 = vld [vmem:[%s1855_s3] ss:$0 sm:$0xff]  ;;  %s1508_s3 = smov 96  }
   0x7   :  { %1324 = vmatpush3.msra.mxu1 %v1580_v4  ;;  %1310 = vmatpush3.msra.mxu0 %v40_v1  ;;  %v184_v26 = vld [vmem:[%s1856_s7] sm:$0xff] }
   0x8   :  { %1311 = vmatprep.mubr.msk.f32.mxu0 %vm49_vm0, %v32_v5  ;;  %1325 = vmatprep.subr.mxu1 %v1504_v6 }
   0x9   :  { %1312 = vmatmul.mubr.msk.f32.vlgmr.msra.gmra.mxu0 %vm49_vm0, %v33_v7  ;;  %1320 = vmatprep.mubr.msk.f32.mxu1 %vm49_vm0, %v38_v8 }
   0xa   :  { %1326 = vmatpush3.msra.mxu1 %v1597_v9  ;;  %1345 = vmatprep.subr.mxu0 %v1504_v6 }
   0xb   :  { %1321 = vmatmul.mubr.msk.f32.gmra.mxu1 %vm49_vm0, %v39_v10  ;;  %1327 = vmatprep.subr.mxu1 %v1504_v6 }
   0xc   :  { %1328 = vmatpush3.msra.mxu1 %v1609_v11  ;;  %1331 = vmatprep.mubr.msk.f32.mxu1 %vm1505_vm1, %v1504_v6 }
   0xd   :  { %1329 = vmatprep.subr.mxu1 %v1504_v6  ;;  %1346 = vmatpush3.msra.mxu0 %v1580_v4 }
   0xe   :  { %1330 = vmatpush3.msra.mxu1 %v1618_v12  ;;  %1347 = vmatprep.subr.mxu0 %v1504_v6 }
   0xf   :  { %1332 = vmatmul.mubr.msk.f32.vlgmr.msra.gmra.mxu1 %vm185_vm2, %v183_v13  ;;  %1334 = vmatprep.subr.mxu1 %v1504_v6 }
  0x10   :  { %1335 = vmatpush3.msra.mxu1 %v1580_v4  ;;  %1342 = vmatprep.mubr.msk.f32.mxu1 %vm1505_vm1, %v1504_v6 }
  0x11   :  { %1336 = vmatprep.subr.mxu1 %v1504_v6  ;;  %1348 = vmatpush3.msra.mxu0 %v1597_v9 }
  0x12   :  { %1337 = vmatpush3.msra.mxu1 %v1597_v9  ;;  %1349 = vmatprep.subr.mxu0 %v1504_v6 }
  0x13   :  { %1338 = vmatprep.subr.mxu1 %v1504_v6  ;;  %1350 = vmatpush3.msra.mxu0 %v1609_v11 }
  0x14   :  { %1339 = vmatpush3.msra.mxu1 %v1609_v11  ;;  %1351 = vmatprep.subr.mxu0 %v1504_v6 }
  0x15   :  { %1340 = vmatprep.subr.mxu1 %v1504_v6  ;;  %1352 = vmatpush3.msra.mxu0 %v1618_v12 }
  0x16   :  { %1341 = vmatpush3.msra.mxu1 %v1618_v12  ;;  %1367 = vmatprep.subr.mxu0 %v1504_v6 }
  0x17   :  { %1356 = vmatprep.subr.mxu1 %v1504_v6  ;;  %1314 = vmatprep.mubr.msk.f32.mxu0 %vm49_vm0, %v34_v51 }
  0x18   :  { %1315 = vmatmul.mubr.msk.f32.gmra.mxu0 %vm49_vm0, %v35_v52 }
  0x19   :  { %1353 = vmatprep.mubr.msk.f32.mxu0 %vm1505_vm1, %v1504_v6 }
  0xc6   :  { %v1648_v14 = vpop.f32.mrf.mxu1 }
  0xc7   :  { %v166_v52 = vadd.f32 %v1648_v14, %v1657_v19 }
  0xc8   :  { %v1650_v15 = vpop.f32.mrf.mxu1 }
  0xc9   :  { %v1313_v16 = vpop.f32.mrf.mxu0 }
  0xca   :  { %v146_v39 = vadd.f32 %v1313_v16, %v1657_v19 }
  0xcb   :  { %v1652_v17 = vpop.f32.mrf.mxu1  ;;  %v140_v18 = vpop.f32.mrf.mxu0 }
  0xcc   :  { %v141_v21 = vadd.f32 %v1657_v19, %v140_v18 }
  0xcd   :  { %v1659_v20 = vpop.f32.mrf.mxu1 }
  0xcf   :  { %v255_v22 = vpop.f32.mrf.mxu1 }
  0xd0   :  { %v259_v23 = vadd.f32 %v255_v22, %v141_v21 }
  0xd1   :  { %v1333_v24 = vpop.f32.mrf.mxu1 }
  0xd2   :  { %1440 = vtanh.f32 %v259_v23 }
  0xd8   :  { %v1316_v57 = vpop.f32.mrf.mxu0 }
  0xd9   :  { %v156_v21 = vadd.f32 %v1316_v57, %v1657_v19 }
  0xda   :  { %v150_v58 = vpop.f32.mrf.mxu0 }
  0xdb   :  { %v151_v59 = vadd.f32 %v1657_v19, %v150_v58 }
  0xdf   :  { %v1441_v25 = vpop.eup %1440 }
  0xe0   :  { %269 = vrot.lane.b32.xlu0 %v1441_v25, %s1506_s18  ;;  %v261_v27 = vmul.f32 0.5, %v1441_v25 }
  0xe2   :  { %v262_v28 = vadd.f32 0.5, %v261_v27 }
  0xe4   :  { %264 = vrot.lane.b32.xlu0 %v184_v26, %s1507_s21 }
 0x152   :  { %v270_v29 = vpop.permute.xlu0 %269 }
 0x153   :  { %v272_v30 = vmul.f32 %v270_v29, %v262_v28 }
 0x155   :  { %274 = vrot.lane.b32.xlu1 %v272_v30, %s1507_s21 }
 0x156   :  { %v265_v31 = vpop.permute.xlu0 %264 }
 0x157   :  { %v267_v32 = vmul.f32 %v265_v31, %v262_v28 }
 0x1c7   :  { %v275_v33 = vpop.permute.xlu1 %274 }
 0x1c8   :  { %v277_v34 = vadd.f32 %v275_v33, %v267_v32 }
 0x1ca   :  { %1442 = vtanh.f32 %v277_v34 }
 0x1d7   :  { %v1443_v35 = vpop.eup %1442 }
 0x1d8   :  { %280 = vrot.lane.b32.xlu1 %v1443_v35, %s1506_s18 }
 0x24a   :  { %v281_v36 = vpop.permute.xlu1 %280 }
 0x24b   :  { %v283_v37 = vmul.f32 %v281_v36, %v262_v28 }
 0x24d   :  { %285 = vrot.lane.b32.xlu0 %v283_v37, %s1507_s21  ;;  %v161_v37 = vadd.f32 %v1657_v19, %v1650_v15 }
 0x2bf   :  { %v286_v38 = vpop.permute.xlu0 %285 }
 0x2c0   :  { %288 = vst.msk [vmem:[#allocation2] sm:$0xff] %vm185_vm2, %v286_v38  ;;  %1343 = vmatmul.mubr.msk.f32.vlgmr.msra.gmra.mxu1 %vm185_vm2, %v286_v38 }
 0x2c1   :  { %1357 = vmatpush3.msra.mxu1 %v1580_v4  ;;  %1364 = vmatprep.mubr.msk.f32.mxu1 %vm1505_vm1, %v1504_v6 }
 0x2c2   :  { %1358 = vmatprep.subr.mxu1 %v1504_v6 }
 0x2c3   :  { %1359 = vmatpush3.msra.mxu1 %v1597_v9 }
 0x2c4   :  { %1360 = vmatprep.subr.mxu1 %v1504_v6 }
 0x2c5   :  { %1361 = vmatpush3.msra.mxu1 %v1609_v11 }
 0x2c6   :  { %1362 = vmatprep.subr.mxu1 %v1504_v6 }
 0x2c7   :  { %1363 = vmatpush3.msra.mxu1 %v1618_v12 }
 0x2c8   :  { %1378 = vmatprep.subr.mxu1 %v1504_v6 }
 0x380   :  { %v357_v40 = vpop.f32.mrf.mxu1 }
 0x381   :  { %v361_v41 = vadd.f32 %v357_v40, %v146_v39 }
 0x382   :  { %v1344_v42 = vpop.f32.mrf.mxu1 }
 0x383   :  { %1444 = vtanh.f32 %v361_v41 }
 0x390   :  { %v1445_v43 = vpop.eup %1444 }
 0x391   :  { %367 = vrot.lane.b32.xlu1 %v1445_v43, %s1506_s18  ;;  %v363_v44 = vmul.f32 0.5, %v1445_v43 }
 0x393   :  { %v364_v45 = vadd.f32 0.5, %v363_v44 }
 0x395   :  { %v365_v48 = vmul.f32 %v364_v45, %v277_v34 }
 0x403   :  { %v368_v46 = vpop.permute.xlu1 %367 }
 0x404   :  { %v370_v47 = vmul.f32 %v368_v46, %v364_v45 }
 0x406   :  { %372 = vrot.lane.b32.xlu0 %v370_v47, %s1507_s21 }
 0x478   :  { %v373_v49 = vpop.permute.xlu0 %372 }
 0x479   :  { %v375_v50 = vadd.f32 %v373_v49, %v365_v48 }
 0x47b   :  { %1446 = vtanh.f32 %v375_v50 }
 0x488   :  { %v1447_v53 = vpop.eup %1446 }
 0x489   :  { %378 = vrot.lane.b32.xlu1 %v1447_v53, %s1506_s18 }
 0x4fb   :  { %v379_v54 = vpop.permute.xlu1 %378 }
 0x4fc   :  { %v381_v55 = vmul.f32 %v379_v54, %v364_v45 }
 0x4fe   :  { %383 = vrot.lane.b32.xlu0 %v381_v55, %s1507_s21 }
 0x570   :  { %v384_v56 = vpop.permute.xlu0 %383 }
 0x571   :  { %386 = vst.msk [vmem:[#allocation2 + $0x8] sm:$0xff] %vm185_vm2, %v384_v56  ;;  %1354 = vmatmul.mubr.msk.f32.vlgmr.msra.gmra.mxu0 %vm185_vm2, %v384_v56 }
 0x572   :  { %1368 = vmatpush3.msra.mxu0 %v1580_v4  ;;  %1375 = vmatprep.mubr.msk.f32.mxu0 %vm1505_vm1, %v1504_v6 }
 0x573   :  { %1369 = vmatprep.subr.mxu0 %v1504_v6 }
 0x574   :  { %1370 = vmatpush3.msra.mxu0 %v1597_v9 }
 0x575   :  { %1371 = vmatprep.subr.mxu0 %v1504_v6 }
 0x576   :  { %1372 = vmatpush3.msra.mxu0 %v1609_v11 }
 0x577   :  { %1373 = vmatprep.subr.mxu0 %v1504_v6 }
 0x578   :  { %1374 = vmatpush3.msra.mxu0 %v1618_v12 }
 0x579   :  { %1389 = vmatprep.subr.mxu0 %v1504_v6 }
 0x631   :  { %v455_v60 = vpop.f32.mrf.mxu0 }
 0x632   :  { %v459_v61 = vadd.f32 %v455_v60, %v151_v59 }
 0x633   :  { %v1355_v62 = vpop.f32.mrf.mxu0 }
 0x634   :  { %1448 = vtanh.f32 %v459_v61 }
 0x641   :  { %v1449_v63 = vpop.eup %1448 }
 0x642   :  { %465 = vrot.lane.b32.xlu1 %v1449_v63, %s1506_s18  ;;  %v461_v0 = vmul.f32 0.5, %v1449_v63  ;;  %v985_v63 = vld [vmem:[%s1857_s4 + $0x10] sm:$0xff] }
 0x644   :  { %v462_v1 = vadd.f32 0.5, %v461_v0  ;;  %v975_v0 = vld [vmem:[#allocation2] sm:$0xff] }
 0x646   :  { %v463_v5 = vmul.f32 %v462_v1, %v375_v50 }
 0x6b4   :  { %v466_v2 = vpop.permute.xlu1 %465 }
 0x6b5   :  { %v468_v3 = vmul.f32 %v466_v2, %v462_v1  ;;  %v983_v2 = vld [vmem:[%s1857_s4] sm:$0xff] }
 0x6b7   :  { %470 = vrot.lane.b32.xlu0 %v468_v3, %s1507_s21  ;;  %v976_v3 = vld [vmem:[#allocation2 + $0x8] sm:$0xff] }
 0x729   :  { %v471_v7 = vpop.permute.xlu0 %470 }
 0x72a   :  { %v473_v8 = vadd.f32 %v471_v7, %v463_v5 }
 0x72c   :  { %1450 = vtanh.f32 %v473_v8 }
 0x739   :  { %v1451_v10 = vpop.eup %1450 }
 0x73a   :  { %476 = vrot.lane.b32.xlu1 %v1451_v10, %s1506_s18 }
 0x7ac   :  { %v477_v13 = vpop.permute.xlu1 %476 }
 0x7ad   :  { %v479_v16 = vmul.f32 %v477_v13, %v462_v1  ;;  %v984_v1 = vld [vmem:[%s1857_s4 + $0x8] sm:$0xff]  ;;  %v171_v13 = vadd.f32 %v1657_v19, %v1659_v20 }
 0x7af   :  { %481 = vrot.lane.b32.xlu0 %v479_v16, %s1507_s21 }
 0x821   :  { %v482_v18 = vpop.permute.xlu0 %481 }
 0x822   :  { %484 = vst.msk [vmem:[#allocation2 + $0x10] sm:$0xff] %vm185_vm2, %v482_v18  ;;  %1365 = vmatmul.mubr.msk.f32.vlgmr.msra.gmra.mxu1 %vm185_vm2, %v482_v18 }
 0x823   :  { %1379 = vmatpush3.msra.mxu1 %v1580_v4  ;;  %1386 = vmatprep.mubr.msk.f32.mxu1 %vm1505_vm1, %v1504_v6 }
 0x824   :  { %1380 = vmatprep.subr.mxu1 %v1504_v6 }
 0x825   :  { %1381 = vmatpush3.msra.mxu1 %v1597_v9 }
 0x826   :  { %1382 = vmatprep.subr.mxu1 %v1504_v6 }
 0x827   :  { %1383 = vmatpush3.msra.mxu1 %v1609_v11 }
 0x828   :  { %1384 = vmatprep.subr.mxu1 %v1504_v6 }
 0x829   :  { %1385 = vmatpush3.msra.mxu1 %v1618_v12  ;;  %v977_v5 = vld [vmem:[#allocation2 + $0x10] sm:$0xff] }
 0x82a   :  { %1400 = vmatprep.subr.mxu1 %v1504_v6 }
 0x8e2   :  { %v553_v22 = vpop.f32.mrf.mxu1 }
 0x8e3   :  { %v557_v23 = vadd.f32 %v553_v22, %v156_v21  ;;  %v1793_v22 = vld [vmem:[%s1858_s5] ss:$0 sm:$0xff] }
 0x8e4   :  { %v1366_v24 = vpop.f32.mrf.mxu1 }
 0x8e5   :  { %1452 = vtanh.f32 %v557_v23 }
 0x8f2   :  { %v1453_v25 = vpop.eup %1452 }
 0x8f3   :  { %563 = vrot.lane.b32.xlu1 %v1453_v25, %s1506_s18  ;;  %v559_v26 = vmul.f32 0.5, %v1453_v25 }
 0x8f5   :  { %v560_v27 = vadd.f32 0.5, %v559_v26 }
 0x8f7   :  { %v561_v30 = vmul.f32 %v560_v27, %v473_v8 }
 0x965   :  { %v564_v28 = vpop.permute.xlu1 %563 }
 0x966   :  { %v566_v29 = vmul.f32 %v564_v28, %v560_v27 }
 0x968   :  { %568 = vrot.lane.b32.xlu0 %v566_v29, %s1507_s21 }
 0x9da   :  { %v569_v31 = vpop.permute.xlu0 %568 }
 0x9db   :  { %v571_v32 = vadd.f32 %v569_v31, %v561_v30 }
 0x9dd   :  { %1454 = vtanh.f32 %v571_v32 }
 0x9ea   :  { %v1455_v33 = vpop.eup %1454 }
 0x9eb   :  { %574 = vrot.lane.b32.xlu1 %v1455_v33, %s1506_s18 }
 0xa5d   :  { %v575_v34 = vpop.permute.xlu1 %574 }
 0xa5e   :  { %v577_v35 = vmul.f32 %v575_v34, %v560_v27 }
 0xa60   :  { %579 = vrot.lane.b32.xlu0 %v577_v35, %s1507_s21 }
 0xad2   :  { %v580_v36 = vpop.permute.xlu0 %579 }
 0xad3   :  { %582 = vst.msk [vmem:[#allocation2 + $0x18] sm:$0xff] %vm185_vm2, %v580_v36  ;;  %1376 = vmatmul.mubr.msk.f32.vlgmr.msra.gmra.mxu0 %vm185_vm2, %v580_v36 }
 0xad4   :  { %1390 = vmatpush3.msra.mxu0 %v1580_v4  ;;  %1397 = vmatprep.mubr.msk.f32.mxu0 %vm1505_vm1, %v1504_v6 }
 0xad5   :  { %1391 = vmatprep.subr.mxu0 %v1504_v6 }
 0xad6   :  { %1392 = vmatpush3.msra.mxu0 %v1597_v9 }
 0xad7   :  { %1393 = vmatprep.subr.mxu0 %v1504_v6 }
 0xad8   :  { %1394 = vmatpush3.msra.mxu0 %v1609_v11 }
 0xad9   :  { %1395 = vmatprep.subr.mxu0 %v1504_v6 }
 0xada   :  { %1396 = vmatpush3.msra.mxu0 %v1618_v12  ;;  %v978_v7 = vld [vmem:[#allocation2 + $0x18] sm:$0xff] }
 0xb93   :  { %v651_v38 = vpop.f32.mrf.mxu0 }
 0xb94   :  { %v655_v39 = vadd.f32 %v651_v38, %v161_v37 }
 0xb95   :  { %v1377_v40 = vpop.f32.mrf.mxu0 }
 0xb96   :  { %1456 = vtanh.f32 %v655_v39 }
 0xba3   :  { %v1457_v41 = vpop.eup %1456 }
 0xba4   :  { %661 = vrot.lane.b32.xlu1 %v1457_v41, %s1506_s18  ;;  %v657_v42 = vmul.f32 0.5, %v1457_v41 }
 0xba6   :  { %v658_v43 = vadd.f32 0.5, %v657_v42 }
 0xba8   :  { %v659_v46 = vmul.f32 %v658_v43, %v571_v32 }
 0xc16   :  { %v662_v44 = vpop.permute.xlu1 %661 }
 0xc17   :  { %v664_v45 = vmul.f32 %v662_v44, %v658_v43 }
 0xc19   :  { %666 = vrot.lane.b32.xlu0 %v664_v45, %s1507_s21 }
 0xc8b   :  { %v667_v47 = vpop.permute.xlu0 %666 }
 0xc8c   :  { %v669_v48 = vadd.f32 %v667_v47, %v659_v46 }
 0xc8e   :  { %1458 = vtanh.f32 %v669_v48 }
 0xc9b   :  { %v1459_v49 = vpop.eup %1458 }
 0xc9c   :  { %672 = vrot.lane.b32.xlu1 %v1459_v49, %s1506_s18 }
 0xd0e   :  { %v673_v15 = vpop.permute.xlu1 %672 }
 0xd0f   :  { %v675_v50 = vmul.f32 %v673_v15, %v658_v43 }
 0xd11   :  { %677 = vrot.lane.b32.xlu0 %v675_v50, %s1507_s21 }
 0xd83   :  { %v678_v51 = vpop.permute.xlu0 %677 }
 0xd84   :  { %680 = vst.msk [vmem:[#allocation2 + $0x20] sm:$0xff] %vm185_vm2, %v678_v51  ;;  %1387 = vmatmul.mubr.msk.f32.vlgmr.msra.gmra.mxu1 %vm185_vm2, %v678_v51 }
 0xd85   :  { %1401 = vmatpush3.msra.mxu1 %v1580_v4  ;;  %1408 = vmatprep.mubr.msk.f32.mxu1 %vm1505_vm1, %v1504_v6 }
 0xd86   :  { %1402 = vmatprep.subr.mxu1 %v1504_v6 }
 0xd87   :  { %1403 = vmatpush3.msra.mxu1 %v1597_v9 }
 0xd88   :  { %1404 = vmatprep.subr.mxu1 %v1504_v6 }
 0xd89   :  { %1405 = vmatpush3.msra.mxu1 %v1609_v11 }
 0xd8a   :  { %1406 = vmatprep.subr.mxu1 %v1504_v6 }
 0xd8b   :  { %1407 = vmatpush3.msra.mxu1 %v1618_v12  ;;  %v986_v12 = vld [vmem:[%s1857_s4 + $0x18] sm:$0xff]  ;;  %v979_v8 = vld [vmem:[#allocation2 + $0x20] sm:$0xff] }
 0xd8c   :  { %1411 = vmatprep.subr.mxu0 %v986_v12 }
 0xe44   :  { %v749_v53 = vpop.f32.mrf.mxu1 }
 0xe45   :  { %v753_v4 = vadd.f32 %v749_v53, %v166_v52 }
 0xe46   :  { %v1388_v54 = vpop.f32.mrf.mxu1 }
 0xe47   :  { %1460 = vtanh.f32 %v753_v4 }
 0xe54   :  { %v1461_v55 = vpop.eup %1460 }
 0xe55   :  { %759 = vrot.lane.b32.xlu1 %v1461_v55, %s1506_s18  ;;  %v755_v56 = vmul.f32 0.5, %v1461_v55 }
 0xe57   :  { %v756_v9 = vadd.f32 0.5, %v755_v56 }
 0xe59   :  { %v757_v11 = vmul.f32 %v756_v9, %v669_v48 }
 0xec7   :  { %v760_v57 = vpop.permute.xlu1 %759 }
 0xec8   :  { %v762_v58 = vmul.f32 %v760_v57, %v756_v9 }
 0xeca   :  { %764 = vrot.lane.b32.xlu0 %v762_v58, %s1507_s21 }
 0xf3c   :  { %v765_v6 = vpop.permute.xlu0 %764 }
 0xf3d   :  { %v1763_v59 = vadd.f32 %v765_v6, %v757_v11 }
 0xf3f   :  { %1462 = vtanh.f32 %v1763_v59 }
 0xf4c   :  { %v1463_v14 = vpop.eup %1462 }
 0xf4d   :  { %770 = vrot.lane.b32.xlu1 %v1463_v14, %s1506_s18 }
 0xfbf   :  { %v771_v60 = vpop.permute.xlu1 %770 }
 0xfc0   :  { %v773_v61 = vmul.f32 %v771_v60, %v756_v9 }
 0xfc2   :  { %775 = vrot.lane.b32.xlu0 %v773_v61, %s1507_s21 }
0x1034   :  { %v776_v62 = vpop.permute.xlu0 %775 }
0x1035   :  { %778 = vst.msk [vmem:[#allocation2 + $0x28] sm:$0xff] %vm185_vm2, %v776_v62  ;;  %1398 = vmatmul.mubr.msk.f32.vlgmr.msra.gmra.mxu0 %vm185_vm2, %v776_v62 }
0x1036   :  { %1412 = vmatpush3.msra.mxu0 %v986_v12  ;;  %1419 = vmatprep.mubr.msk.f32.mxu0 %vm185_vm2, %v975_v0 }
0x1037   :  { %1413 = vmatprep.subr.mxu0 %v985_v63 }
0x1038   :  { %1414 = vmatpush3.msra.mxu0 %v985_v63 }
0x1039   :  { %1415 = vmatprep.subr.mxu0 %v984_v1 }
0x103a   :  { %1416 = vmatpush3.msra.mxu0 %v984_v1 }
0x103b   :  { %1417 = vmatprep.subr.mxu0 %v983_v2 }
0x103c   :  { %1418 = vmatpush3.msra.mxu0 %v983_v2  ;;  %v980_v10 = vld [vmem:[#allocation2 + $0x28] sm:$0xff] }
0x103d   :  { %1420 = vmatmul.mubr.msk.f32.vlgmr.msra.gmra.mxu0 %vm185_vm2, %v976_v3 }
0x103e   :  { %1422 = vmatprep.mubr.msk.f32.mxu0 %vm185_vm2, %v977_v5 }
0x1041   :  { %1423 = vmatmul.mubr.msk.f32.gmra.mxu0 %vm185_vm2, %v978_v7 }
0x1042   :  { %1425 = vmatprep.mubr.msk.f32.mxu0 %vm185_vm2, %v979_v8 }
0x1045   :  { %1426 = vmatmul.mubr.msk.f32.gmra.mxu0 %vm185_vm2, %v980_v10 }
0x10f5   :  { %v847_v16 = vpop.f32.mrf.mxu0 }
0x10f6   :  { %v851_v18 = vadd.f32 %v847_v16, %v171_v13 }
0x10f7   :  { %v1399_v21 = vpop.f32.mrf.mxu0 }
0x10f8   :  { %1464 = vtanh.f32 %v851_v18 }
0x10fd   :  { %v1421_v23 = vpop.f32.mrf.mxu0 }
0x10fe   :  { %v1090_v24 = vadd.f32 %v1421_v23, %v1793_v22 }
0x10ff   :  { %v1084_v25 = vpop.f32.mrf.mxu0 }
0x1100   :  { %v1231_v26 = vmul.f32 -1.442695, %v1090_v24  ;;  %v1085_v27 = vadd.f32 %v1793_v22, %v1084_v25 }
0x1101   :  { %v1424_v28 = vpop.f32.mrf.mxu0 }
0x1102   :  { %1466 = vpow2.f32 %v1231_v26  ;;  %v1230_v29 = vmul.f32 -1.442695, %v1085_v27  ;;  %v1100_v20 = vadd.f32 %v1424_v28, %v1793_v22 }
0x1103   :  { %v1094_v30 = vpop.f32.mrf.mxu0 }
0x1104   :  { %1468 = vpow2.f32 %v1230_v29  ;;  %v1233_v31 = vmul.f32 -1.442695, %v1100_v20  ;;  %v1095_v32 = vadd.f32 %v1793_v22, %v1094_v30 }
0x1105   :  { %v1465_v33 = vpop.eup %1464  ;;  %v1427_v34 = vpop.f32.mrf.mxu0 }
0x1106   :  { %1470 = vpow2.f32 %v1233_v31  ;;  %v1232_v35 = vmul.f32 -1.442695, %v1095_v32  ;;  %v1110_v36 = vadd.f32 %v1427_v34, %v1793_v22  ;;  %857 = vrot.lane.b32.xlu1 %v1465_v33, %s1506_s18  ;;  %v853_v9 = vmul.f32 0.5, %v1465_v33 }
0x1107   :  { %v1104_v37 = vpop.f32.mrf.mxu0 }
0x1108   :  { %1472 = vpow2.f32 %v1232_v35  ;;  %v1235_v38 = vmul.f32 -1.442695, %v1110_v36  ;;  %v1105_v39 = vadd.f32 %v1793_v22, %v1104_v37  ;;  %v854_v57 = vadd.f32 0.5, %v853_v9 }
0x110a   :  { %1474 = vpow2.f32 %v1235_v38  ;;  %v1234_v40 = vmul.f32 -1.442695, %v1105_v39  ;;  %v855_v6 = vmul.f32 %v854_v57, %v1763_v59  ;;  %v176_v59 = vadd.f32 %v1652_v17, %v1657_v19 }
0x110c   :  { %1476 = vpow2.f32 %v1234_v40 }
0x110f   :  { %v1467_v41 = vpop.eup %1466 }
0x1110   :  { %v1148_v42 = vadd.f32 1.0, %v1467_v41 }
0x1111   :  { %v1469_v43 = vpop.eup %1468 }
0x1112   :  { %1478 = vrcp.f32 %v1148_v42  ;;  %v1147_v44 = vadd.f32 1.0, %v1469_v43 }
0x1113   :  { %v1471_v45 = vpop.eup %1470 }
0x1114   :  { %1480 = vrcp.f32 %v1147_v44  ;;  %v1150_v46 = vadd.f32 1.0, %v1471_v45 }
0x1115   :  { %v1473_v47 = vpop.eup %1472 }
0x1116   :  { %1482 = vrcp.f32 %v1150_v46  ;;  %v1149_v48 = vadd.f32 1.0, %v1473_v47 }
0x1117   :  { %v1475_v49 = vpop.eup %1474 }
0x1118   :  { %1484 = vrcp.f32 %v1149_v48  ;;  %v1152_v15 = vadd.f32 1.0, %v1475_v49 }
0x1119   :  { %v1477_v50 = vpop.eup %1476 }
0x111a   :  { %1486 = vrcp.f32 %v1152_v15  ;;  %v1151_v51 = vadd.f32 1.0, %v1477_v50 }
0x111c   :  { %1488 = vrcp.f32 %v1151_v51 }
0x111f   :  { %v1479_v52 = vpop.eup %1478 }
0x1120   :  { %1238 = vst [vmem:[%s1859_s8 + $0x8] sm:$0xff] %v1479_v52 }
0x1121   :  { %v1481_v53 = vpop.eup %1480 }
0x1122   :  { %1171 = vst [vmem:[%s1859_s8] sm:$0xff] %v1481_v53 }
0x1123   :  { %v1483_v4 = vpop.eup %1482 }
0x1124   :  { %1240 = vst [vmem:[%s1859_s8 + $0x18] sm:$0xff] %v1483_v4 }
0x1125   :  { %v1485_v54 = vpop.eup %1484 }
0x1126   :  { %1239 = vst [vmem:[%s1859_s8 + $0x10] sm:$0xff] %v1485_v54 }
0x1127   :  { %v1487_v55 = vpop.eup %1486 }
0x1128   :  { %1242 = vst [vmem:[%s1859_s8 + $0x28] sm:$0xff] %v1487_v55 }
0x1129   :  { %v1489_v56 = vpop.eup %1488 }
0x112a   :  { %1241 = vst [vmem:[%s1859_s8 + $0x20] sm:$0xff] %v1489_v56 }
0x1178   :  { %v858_v58 = vpop.permute.xlu1 %857 }
0x1179   :  { %v860_v11 = vmul.f32 %v858_v58, %v854_v57 }
0x117b   :  { %862 = vrot.lane.b32.xlu0 %v860_v11, %s1507_s21 }
0x11ed   :  { %v863_v12 = vpop.permute.xlu0 %862 }
0x11ee   :  { %v865_v14 = vadd.f32 %v863_v12, %v855_v6 }
0x11f0   :  { %1490 = vtanh.f32 %v865_v14 }
0x11fd   :  { %v1491_v60 = vpop.eup %1490 }
0x11fe   :  { %868 = vrot.lane.b32.xlu1 %v1491_v60, %s1506_s18 }
0x1270   :  { %v869_v61 = vpop.permute.xlu1 %868 }
0x1271   :  { %v871_v62 = vmul.f32 %v869_v61, %v854_v57 }
0x1273   :  { %873 = vrot.lane.b32.xlu0 %v871_v62, %s1507_s21 }
0x12e5   :  { %v874_v63 = vpop.permute.xlu0 %873 }
0x12e6   :  { %876 = vst.msk [vmem:[#allocation2 + $0x30] sm:$0xff] %vm185_vm2, %v874_v63  ;;  %1409 = vmatmul.mubr.msk.f32.vlgmr.msra.gmra.mxu1 %vm185_vm2, %v874_v63 }
0x12ed   :  { %v981_v0 = vld [vmem:[#allocation2 + $0x30] sm:$0xff] }
0x12ee   :  { %1428 = vmatprep.mubr.msk.f32.mxu0 %vm185_vm2, %v981_v0 }
0x13a6   :  { %v945_v1 = vpop.f32.mrf.mxu1 }
0x13a7   :  { %v949_v2 = vadd.f32 %v945_v1, %v176_v59 }
0x13a8   :  { %v1410_v3 = vpop.f32.mrf.mxu1 }
0x13a9   :  { %1492 = vtanh.f32 %v949_v2 }
0x13b6   :  { %v1493_v5 = vpop.eup %1492 }
0x13b7   :  { %955 = vrot.lane.b32.xlu1 %v1493_v5, %s1506_s18  ;;  %v951_v7 = vmul.f32 0.5, %v1493_v5 }
0x13b9   :  { %v952_v8 = vadd.f32 0.5, %v951_v7 }
0x13bb   :  { %v953_v16 = vmul.f32 %v952_v8, %v865_v14 }
0x1429   :  { %v956_v10 = vpop.permute.xlu1 %955 }
0x142a   :  { %v958_v13 = vmul.f32 %v956_v10, %v952_v8 }
0x142c   :  { %960 = vrot.lane.b32.xlu0 %v958_v13, %s1507_s21 }
0x149e   :  { %v961_v18 = vpop.permute.xlu0 %960 }
0x149f   :  { %v963_v21 = vadd.f32 %v961_v18, %v953_v16 }
0x14a1   :  { %1494 = vtanh.f32 %v963_v21 }
0x14ae   :  { %v1495_v23 = vpop.eup %1494 }
0x14af   :  { %966 = vrot.lane.b32.xlu1 %v1495_v23, %s1506_s18 }
0x14b3   :  { %1188 = vrot.lane.b32.xlu1 %v963_v21, %s1508_s3 }
0x1521   :  { %v967_v17 = vpop.permute.xlu1 %966 }
0x1522   :  { %v969_v19 = vmul.f32 %v967_v17, %v952_v8 }
0x1524   :  { %971 = vrot.lane.b32.xlu0 %v969_v19, %s1507_s21 }
0x1525   :  { %v1189_v24 = vpop.permute.xlu1 %1188 }
0x1526   :  { %1191 = vst.msk [vmem:[%s1860_s10] sm:$0xff] %vm185_vm2, %v1189_v24 }
0x1596   :  { %v972_v25 = vpop.permute.xlu0 %971 }
0x1597   :  { %974 = vst.msk [vmem:[#allocation2 + $0x38] sm:$0xff] %vm185_vm2, %v972_v25  ;;  %1186 = vst.msk [vmem:[%s1861_s9] sm:$0xff] %vm185_vm2, %v972_v25 }
0x159e   :  { %v982_v26 = vld [vmem:[#allocation2 + $0x38] sm:$0xff] }
0x159f   :  { %1429 = vmatmul.mubr.msk.f32.gmra.mxu0 %vm185_vm2, %v982_v26 }
0x165f   :  { %v1430_v27 = vpop.f32.mrf.mxu0 }
0x1660   :  { %v1120_v28 = vadd.f32 %v1430_v27, %v1793_v22 }
0x1661   :  { %v1114_v29 = vpop.f32.mrf.mxu0 }
0x1662   :  { %v1237_v20 = vmul.f32 -1.442695, %v1120_v28  ;;  %v1115_v30 = vadd.f32 %v1793_v22, %v1114_v29 }
0x1664   :  { %1496 = vpow2.f32 %v1237_v20  ;;  %v1236_v31 = vmul.f32 -1.442695, %v1115_v30 }
0x1666   :  { %1498 = vpow2.f32 %v1236_v31 }
0x1671   :  { %v1497_v32 = vpop.eup %1496 }
0x1672   :  { %v1154_v33 = vadd.f32 1.0, %v1497_v32 }
0x1673   :  { %v1499_v34 = vpop.eup %1498 }
0x1674   :  { %1500 = vrcp.f32 %v1154_v33  ;;  %v1153_v35 = vadd.f32 1.0, %v1499_v34 }
0x1676   :  { %1502 = vrcp.f32 %v1153_v35 }
0x1681   :  { %v1501_v36 = vpop.eup %1500 }
0x1682   :  { %1244 = vst [vmem:[%s1859_s8 + $0x38] sm:$0xff] %v1501_v36 }
0x1683   :  { %v1503_v37 = vpop.eup %1502 }
0x1684   :  { %1243 = vst [vmem:[%s1859_s8 + $0x30] sm:$0xff] %v1503_v37 }

</bundles_post_ra>
